<compile_context>
chip_gen: v5e
topology: v5e:2x2
jax: 0.10.0
libtpu: 0.0.40
codegen_flags: <defaults>
</compile_context>

<pallas_src>
import math

import jax
import jax.numpy as jnp
from jax.experimental import pallas as pl
from jax.experimental.pallas import tpu as pltpu

_SUBLANE = 8


def _round_up(n, m):
    return ((n + m - 1) // m) * m


def _mlp_kernel(x_ref,
                w1_ref, b1_ref,
                w2_ref, b2_ref,
                w3_ref, b3_ref,
                w4_ref, b4_ref,
                w5_ref, b5_ref,
                w6_ref, b6_ref,
                o_ref):
    """One batch tile of the fused 6-layer MLP.

    Weights arrive as bf16 (fed straight to the MXU); the running activation is
    kept in f32 between layers and only cast to bf16 at each dot so that the
    bias add / ReLU stay on the f32 VPU path (portable to v5e; negligible cost
    on v6e/v7x at these widths).
    """
    def dense(h, w_ref, b_ref, relu):
        lhs = h if h.dtype == jnp.bfloat16 else h.astype(jnp.bfloat16)
        y = jnp.dot(lhs, w_ref[...],
                    preferred_element_type=jnp.float32) + b_ref[...]
        if relu:
            y = jnp.maximum(y, 0.0)
        return y

    h = x_ref[...]                       # bf16 (tb, insize), no cast needed
    h = dense(h, w1_ref, b1_ref, True)
    h = dense(h, w2_ref, b2_ref, True)
    h = dense(h, w3_ref, b3_ref, True)
    h = dense(h, w4_ref, b4_ref, True)
    h = dense(h, w5_ref, b5_ref, True)
    o_ref[...] = dense(h, w6_ref, b6_ref, False)   # f32, no ReLU


def inverse_icm_forward(x, params, *, block_batch=4096, vmem_limit_bytes=None):
    """x: [B, insize]; params: list of (W[in,out], b[1,out]) per layer."""
    B, insize = x.shape
    hidden = params[0][0].shape[1]
    outsize = params[-1][0].shape[1]

    # --- parameters: bf16 weights (MXU-native), f32 biases.  ~19 KB total,
    # so with constant block indices they stay VMEM-resident across the grid.
    flat = []
    for (w, b) in params:
        flat.append(w.astype(jnp.bfloat16))
        flat.append(b.astype(jnp.float32))

    # --- input: single bf16 cast in the wrapper (halves the x DMA stream).
    x = x.astype(jnp.bfloat16)

    # --- batch tile: big (default 4096) but capped so the grid has >=2 steps
    # when B permits (lets "parallel" shard across v7x's two TensorCores).
    # No batch padding: grid = cdiv(B, tb); Pallas masks the ragged last block.
    tb = min(block_batch, _round_up(max(pl.cdiv(B, 2), 1), _SUBLANE))
    tb = max(tb, _SUBLANE)
    grid = (pl.cdiv(B, tb),)

    in_specs = [pl.BlockSpec((tb, insize), lambda i: (i, 0))]
    for arr in flat:
        # Constant block index across the grid -> parameter tiles are not
        # re-DMAed per grid step.
        in_specs.append(pl.BlockSpec(arr.shape, lambda i: (0, 0)))
    out_specs = pl.BlockSpec((tb, outsize), lambda i: (i, 0))

    flops = 2 * B * (insize * hidden + 4 * hidden * hidden + hidden * outsize)
    param_bytes = sum(int(a.size) * a.dtype.itemsize for a in flat)
    bytes_accessed = B * insize * 2 + B * outsize * 4 + param_bytes

    out = pl.pallas_call(
        _mlp_kernel,
        out_shape=jax.ShapeDtypeStruct((B, outsize), jnp.float32),
        grid=grid,
        in_specs=in_specs,
        out_specs=out_specs,
        compiler_params=pltpu.CompilerParams(
            dimension_semantics=("parallel",),
            vmem_limit_bytes=vmem_limit_bytes),
        cost_estimate=pl.CostEstimate(
            flops=flops, transcendentals=0, bytes_accessed=bytes_accessed),
    )(x, *flat)
    return out


def init_params(key, insize, hidden_size, outsize):
    """Deterministic init matching nn.Linear's U(-1/sqrt(fan_in), +1/sqrt(fan_in)).

    Weights are [in, out] (transposed vs. PyTorch's [out, in])."""
    dims = [(insize, hidden_size),
            (hidden_size, hidden_size),
            (hidden_size, hidden_size),
            (hidden_size, hidden_size),
            (hidden_size, hidden_size),
            (hidden_size, outsize)]
    params = []
    for (fan_in, fan_out) in dims:
        key, kw, kb = jax.random.split(key, 3)
        bound = 1.0 / math.sqrt(fan_in)
        w = jax.random.uniform(kw, (fan_in, fan_out), jnp.float32, -bound, bound)
        b = jax.random.uniform(kb, (1, fan_out), jnp.float32, -bound, bound)
        params.append((w, b))
    return params


def reference_forward(x, params, emulate_bf16=False):
    """Pure-JAX reference. emulate_bf16=True mimics the kernel's numerics."""
    h = x.astype(jnp.float32)
    n = len(params)
    for i, (w, b) in enumerate(params):
        if emulate_bf16:
            y = jnp.dot(h.astype(jnp.bfloat16), w.astype(jnp.bfloat16),
                        preferred_element_type=jnp.float32) + b
        else:
            y = h @ w + b
        if i < n - 1:
            y = jnp.maximum(y, 0.0)
        h = y
    return h


if __name__ == "__main__":
    # Small shapes consistent with the module: insize=16, hidden_size=32, outsize=4.
    batch, insize, hidden_size, outsize = 8, 16, 32, 4

    key = jax.random.PRNGKey(0)
    key, kx = jax.random.split(key)
    x = jax.random.normal(kx, (batch, insize), jnp.float32)
    params = init_params(key, insize, hidden_size, outsize)

    out = jax.block_until_ready(inverse_icm_forward(x, params))
    assert out.shape == (batch, outsize)

    # Tight check against a reference that mimics the kernel's bf16-weight /
    # f32-accumulate numerics.
    ref_bf16 = reference_forward(x, params, emulate_bf16=True)
    assert jnp.allclose(out, ref_bf16, atol=1e-3, rtol=1e-3), "mismatch vs bf16 reference"

    # Loose check against the pure-f32 (PyTorch-equivalent) forward.
    ref_f32 = reference_forward(x, params, emulate_bf16=False)
    assert jnp.allclose(out, ref_f32, atol=5e-2, rtol=5e-2), "mismatch vs f32 reference"

    print("KERNEL_OK")
</pallas_src>

<mosaic_0001>
module attributes {stable_mosaic.version = 11 : i64} {
  func.func @_mlp_kernel(%arg0: i32, %arg1: memref<8x16xbf16, #tpu.memory_space<vmem>>, %arg2: memref<16x32xbf16, #tpu.memory_space<vmem>>, %arg3: memref<1x32xf32, #tpu.memory_space<vmem>>, %arg4: memref<32x32xbf16, #tpu.memory_space<vmem>>, %arg5: memref<1x32xf32, #tpu.memory_space<vmem>>, %arg6: memref<32x32xbf16, #tpu.memory_space<vmem>>, %arg7: memref<1x32xf32, #tpu.memory_space<vmem>>, %arg8: memref<32x32xbf16, #tpu.memory_space<vmem>>, %arg9: memref<1x32xf32, #tpu.memory_space<vmem>>, %arg10: memref<32x32xbf16, #tpu.memory_space<vmem>>, %arg11: memref<1x32xf32, #tpu.memory_space<vmem>>, %arg12: memref<32x4xbf16, #tpu.memory_space<vmem>>, %arg13: memref<1x4xf32, #tpu.memory_space<vmem>>, %arg14: memref<8x4xf32, #tpu.memory_space<vmem>>) attributes {dimension_semantics = [#tpu.dimension_semantics<parallel>], iteration_bounds = array<i64: 1>, scalar_prefetch = 0 : i64, scratch_operands = 0 : i64, tpu.core_type = #tpu.core_type<tc>, window_params = [{transform_indices = @transform_0, window_bounds = array<i64: 8, 16>}, {pipeline_mode = #tpu.pipeline_mode<synchronous>, transform_indices = @transform_1, window_bounds = array<i64: 16, 32>}, {pipeline_mode = #tpu.pipeline_mode<synchronous>, transform_indices = @transform_2, window_bounds = array<i64: 1, 32>}, {pipeline_mode = #tpu.pipeline_mode<synchronous>, transform_indices = @transform_3, window_bounds = array<i64: 32, 32>}, {pipeline_mode = #tpu.pipeline_mode<synchronous>, transform_indices = @transform_4, window_bounds = array<i64: 1, 32>}, {pipeline_mode = #tpu.pipeline_mode<synchronous>, transform_indices = @transform_5, window_bounds = array<i64: 32, 32>}, {pipeline_mode = #tpu.pipeline_mode<synchronous>, transform_indices = @transform_6, window_bounds = array<i64: 1, 32>}, {pipeline_mode = #tpu.pipeline_mode<synchronous>, transform_indices = @transform_7, window_bounds = array<i64: 32, 32>}, {pipeline_mode = #tpu.pipeline_mode<synchronous>, transform_indices = @transform_8, window_bounds = array<i64: 1, 32>}, {pipeline_mode = #tpu.pipeline_mode<synchronous>, transform_indices = @transform_9, window_bounds = array<i64: 32, 32>}, {pipeline_mode = #tpu.pipeline_mode<synchronous>, transform_indices = @transform_10, window_bounds = array<i64: 1, 32>}, {pipeline_mode = #tpu.pipeline_mode<synchronous>, transform_indices = @transform_11, window_bounds = array<i64: 32, 4>}, {pipeline_mode = #tpu.pipeline_mode<synchronous>, transform_indices = @transform_12, window_bounds = array<i64: 1, 4>}, {transform_indices = @transform_13, window_bounds = array<i64: 8, 4>}]} {
    %c0 = arith.constant 0 : index
    %c0_0 = arith.constant 0 : index
    %0 = vector.load %arg1[%c0, %c0_0] : memref<8x16xbf16, #tpu.memory_space<vmem>>, vector<8x16xbf16>
    %c0_1 = arith.constant 0 : index
    %c0_2 = arith.constant 0 : index
    %1 = vector.load %arg2[%c0_1, %c0_2] : memref<16x32xbf16, #tpu.memory_space<vmem>>, vector<16x32xbf16>
    %cst = arith.constant dense<0.000000e+00> : vector<8x32xf32>
    %2 = tpu.matmul %0, %1, %cst {dimension_numbers = #tpu.dot_dimension_numbers<[1], [0], [0], [1], [0, 0, 1, 1], [], []>} : vector<8x16xbf16>, vector<16x32xbf16>, vector<8x32xf32> -> vector<8x32xf32>
    %c0_3 = arith.constant 0 : index
    %c0_4 = arith.constant 0 : index
    %3 = vector.load %arg3[%c0_3, %c0_4] : memref<1x32xf32, #tpu.memory_space<vmem>>, vector<1x32xf32>
    %4 = vector.broadcast %3 : vector<1x32xf32> to vector<8x32xf32>
    %5 = arith.addf %2, %4 : vector<8x32xf32>
    %cst_5 = arith.constant 0.000000e+00 : f32
    %6 = vector.broadcast %cst_5 : f32 to vector<8x32xf32>
    %7 = arith.maximumf %5, %6 : vector<8x32xf32>
    %8 = arith.truncf %7 : vector<8x32xf32> to vector<8x32xbf16>
    %c0_6 = arith.constant 0 : index
    %c0_7 = arith.constant 0 : index
    %9 = vector.load %arg4[%c0_6, %c0_7] : memref<32x32xbf16, #tpu.memory_space<vmem>>, vector<32x32xbf16>
    %cst_8 = arith.constant dense<0.000000e+00> : vector<8x32xf32>
    %10 = tpu.matmul %8, %9, %cst_8 {dimension_numbers = #tpu.dot_dimension_numbers<[1], [0], [0], [1], [0, 0, 1, 1], [], []>} : vector<8x32xbf16>, vector<32x32xbf16>, vector<8x32xf32> -> vector<8x32xf32>
    %c0_9 = arith.constant 0 : index
    %c0_10 = arith.constant 0 : index
    %11 = vector.load %arg5[%c0_9, %c0_10] : memref<1x32xf32, #tpu.memory_space<vmem>>, vector<1x32xf32>
    %12 = vector.broadcast %11 : vector<1x32xf32> to vector<8x32xf32>
    %13 = arith.addf %10, %12 : vector<8x32xf32>
    %cst_11 = arith.constant 0.000000e+00 : f32
    %14 = vector.broadcast %cst_11 : f32 to vector<8x32xf32>
    %15 = arith.maximumf %13, %14 : vector<8x32xf32>
    %16 = arith.truncf %15 : vector<8x32xf32> to vector<8x32xbf16>
    %c0_12 = arith.constant 0 : index
    %c0_13 = arith.constant 0 : index
    %17 = vector.load %arg6[%c0_12, %c0_13] : memref<32x32xbf16, #tpu.memory_space<vmem>>, vector<32x32xbf16>
    %cst_14 = arith.constant dense<0.000000e+00> : vector<8x32xf32>
    %18 = tpu.matmul %16, %17, %cst_14 {dimension_numbers = #tpu.dot_dimension_numbers<[1], [0], [0], [1], [0, 0, 1, 1], [], []>} : vector<8x32xbf16>, vector<32x32xbf16>, vector<8x32xf32> -> vector<8x32xf32>
    %c0_15 = arith.constant 0 : index
    %c0_16 = arith.constant 0 : index
    %19 = vector.load %arg7[%c0_15, %c0_16] : memref<1x32xf32, #tpu.memory_space<vmem>>, vector<1x32xf32>
    %20 = vector.broadcast %19 : vector<1x32xf32> to vector<8x32xf32>
    %21 = arith.addf %18, %20 : vector<8x32xf32>
    %cst_17 = arith.constant 0.000000e+00 : f32
    %22 = vector.broadcast %cst_17 : f32 to vector<8x32xf32>
    %23 = arith.maximumf %21, %22 : vector<8x32xf32>
    %24 = arith.truncf %23 : vector<8x32xf32> to vector<8x32xbf16>
    %c0_18 = arith.constant 0 : index
    %c0_19 = arith.constant 0 : index
    %25 = vector.load %arg8[%c0_18, %c0_19] : memref<32x32xbf16, #tpu.memory_space<vmem>>, vector<32x32xbf16>
    %cst_20 = arith.constant dense<0.000000e+00> : vector<8x32xf32>
    %26 = tpu.matmul %24, %25, %cst_20 {dimension_numbers = #tpu.dot_dimension_numbers<[1], [0], [0], [1], [0, 0, 1, 1], [], []>} : vector<8x32xbf16>, vector<32x32xbf16>, vector<8x32xf32> -> vector<8x32xf32>
    %c0_21 = arith.constant 0 : index
    %c0_22 = arith.constant 0 : index
    %27 = vector.load %arg9[%c0_21, %c0_22] : memref<1x32xf32, #tpu.memory_space<vmem>>, vector<1x32xf32>
    %28 = vector.broadcast %27 : vector<1x32xf32> to vector<8x32xf32>
    %29 = arith.addf %26, %28 : vector<8x32xf32>
    %cst_23 = arith.constant 0.000000e+00 : f32
    %30 = vector.broadcast %cst_23 : f32 to vector<8x32xf32>
    %31 = arith.maximumf %29, %30 : vector<8x32xf32>
    %32 = arith.truncf %31 : vector<8x32xf32> to vector<8x32xbf16>
    %c0_24 = arith.constant 0 : index
    %c0_25 = arith.constant 0 : index
    %33 = vector.load %arg10[%c0_24, %c0_25] : memref<32x32xbf16, #tpu.memory_space<vmem>>, vector<32x32xbf16>
    %cst_26 = arith.constant dense<0.000000e+00> : vector<8x32xf32>
    %34 = tpu.matmul %32, %33, %cst_26 {dimension_numbers = #tpu.dot_dimension_numbers<[1], [0], [0], [1], [0, 0, 1, 1], [], []>} : vector<8x32xbf16>, vector<32x32xbf16>, vector<8x32xf32> -> vector<8x32xf32>
    %c0_27 = arith.constant 0 : index
    %c0_28 = arith.constant 0 : index
    %35 = vector.load %arg11[%c0_27, %c0_28] : memref<1x32xf32, #tpu.memory_space<vmem>>, vector<1x32xf32>
    %36 = vector.broadcast %35 : vector<1x32xf32> to vector<8x32xf32>
    %37 = arith.addf %34, %36 : vector<8x32xf32>
    %cst_29 = arith.constant 0.000000e+00 : f32
    %38 = vector.broadcast %cst_29 : f32 to vector<8x32xf32>
    %39 = arith.maximumf %37, %38 : vector<8x32xf32>
    %40 = arith.truncf %39 : vector<8x32xf32> to vector<8x32xbf16>
    %c0_30 = arith.constant 0 : index
    %c0_31 = arith.constant 0 : index
    %41 = vector.load %arg12[%c0_30, %c0_31] : memref<32x4xbf16, #tpu.memory_space<vmem>>, vector<32x4xbf16>
    %cst_32 = arith.constant dense<0.000000e+00> : vector<8x4xf32>
    %42 = tpu.matmul %40, %41, %cst_32 {dimension_numbers = #tpu.dot_dimension_numbers<[1], [0], [0], [1], [0, 0, 1, 1], [], []>} : vector<8x32xbf16>, vector<32x4xbf16>, vector<8x4xf32> -> vector<8x4xf32>
    %c0_33 = arith.constant 0 : index
    %c0_34 = arith.constant 0 : index
    %43 = vector.load %arg13[%c0_33, %c0_34] : memref<1x4xf32, #tpu.memory_space<vmem>>, vector<1x4xf32>
    %44 = vector.broadcast %43 : vector<1x4xf32> to vector<8x4xf32>
    %45 = arith.addf %42, %44 : vector<8x4xf32>
    %c0_35 = arith.constant 0 : index
    %c0_36 = arith.constant 0 : index
    %46 = vector.load %arg14[%c0_35, %c0_36] : memref<8x4xf32, #tpu.memory_space<vmem>>, vector<8x4xf32>
    tpu.vector_store %arg14[%c0_35, %c0_36], %45 {strides = array<i32>} : memref<8x4xf32, #tpu.memory_space<vmem>>, vector<8x4xf32>,
    return
  }
  func.func @transform_0(%arg0: i32) -> (i32, i32) {
    %c0_i32 = arith.constant 0 : i32
    %c0_i32_0 = arith.constant 0 : i32
    return %arg0, %c0_i32 : i32, i32
  }
  func.func @transform_1(%arg0: i32) -> (i32, i32) {
    %c0_i32 = arith.constant 0 : i32
    %c0_i32_0 = arith.constant 0 : i32
    %c0_i32_1 = arith.constant 0 : i32
    return %c0_i32, %c0_i32_0 : i32, i32
  }
  func.func @transform_2(%arg0: i32) -> (i32, i32) {
    %c0_i32 = arith.constant 0 : i32
    %c0_i32_0 = arith.constant 0 : i32
    %c0_i32_1 = arith.constant 0 : i32
    return %c0_i32, %c0_i32_0 : i32, i32
  }
  func.func @transform_3(%arg0: i32) -> (i32, i32) {
    %c0_i32 = arith.constant 0 : i32
    %c0_i32_0 = arith.constant 0 : i32
    %c0_i32_1 = arith.constant 0 : i32
    return %c0_i32, %c0_i32_0 : i32, i32
  }
  func.func @transform_4(%arg0: i32) -> (i32, i32) {
    %c0_i32 = arith.constant 0 : i32
    %c0_i32_0 = arith.constant 0 : i32
    %c0_i32_1 = arith.constant 0 : i32
    return %c0_i32, %c0_i32_0 : i32, i32
  }
  func.func @transform_5(%arg0: i32) -> (i32, i32) {
    %c0_i32 = arith.constant 0 : i32
    %c0_i32_0 = arith.constant 0 : i32
    %c0_i32_1 = arith.constant 0 : i32
    return %c0_i32, %c0_i32_0 : i32, i32
  }
  func.func @transform_6(%arg0: i32) -> (i32, i32) {
    %c0_i32 = arith.constant 0 : i32
    %c0_i32_0 = arith.constant 0 : i32
    %c0_i32_1 = arith.constant 0 : i32
    return %c0_i32, %c0_i32_0 : i32, i32
  }
  func.func @transform_7(%arg0: i32) -> (i32, i32) {
    %c0_i32 = arith.constant 0 : i32
    %c0_i32_0 = arith.constant 0 : i32
    %c0_i32_1 = arith.constant 0 : i32
    return %c0_i32, %c0_i32_0 : i32, i32
  }
  func.func @transform_8(%arg0: i32) -> (i32, i32) {
    %c0_i32 = arith.constant 0 : i32
    %c0_i32_0 = arith.constant 0 : i32
    %c0_i32_1 = arith.constant 0 : i32
    return %c0_i32, %c0_i32_0 : i32, i32
  }
  func.func @transform_9(%arg0: i32) -> (i32, i32) {
    %c0_i32 = arith.constant 0 : i32
    %c0_i32_0 = arith.constant 0 : i32
    %c0_i32_1 = arith.constant 0 : i32
    return %c0_i32, %c0_i32_0 : i32, i32
  }
  func.func @transform_10(%arg0: i32) -> (i32, i32) {
    %c0_i32 = arith.constant 0 : i32
    %c0_i32_0 = arith.constant 0 : i32
    %c0_i32_1 = arith.constant 0 : i32
    return %c0_i32, %c0_i32_0 : i32, i32
  }
  func.func @transform_11(%arg0: i32) -> (i32, i32) {
    %c0_i32 = arith.constant 0 : i32
    %c0_i32_0 = arith.constant 0 : i32
    %c0_i32_1 = arith.constant 0 : i32
    return %c0_i32, %c0_i32_0 : i32, i32
  }
  func.func @transform_12(%arg0: i32) -> (i32, i32) {
    %c0_i32 = arith.constant 0 : i32
    %c0_i32_0 = arith.constant 0 : i32
    %c0_i32_1 = arith.constant 0 : i32
    return %c0_i32, %c0_i32_0 : i32, i32
  }
  func.func @transform_13(%arg0: i32) -> (i32, i32) {
    %c0_i32 = arith.constant 0 : i32
    %c0_i32_0 = arith.constant 0 : i32
    return %arg0, %c0_i32 : i32, i32
  }
}

</mosaic_0001>

<bundles_post_ra>
// kernel: tpu_custom_call.1
= control target key start
LH: loop header
LB: loop body
LE: loop exit
PB: predicated region body
PF: predicated region fallthrough
CT: control target
= control target key end

     0   :  { %18 = vsyncpa [#allocation3], 0  ;;  %s724_s0 = inlined_call_operand.vmem [shape: bf16[8,16], index: 0, kind: input, shape index: {}]   ;;  %s725_s1 = inlined_call_operand.hbm [shape: bf16[16,32], index: 1, kind: input, shape index: {}]   ;;  %s726_s2 = inlined_call_operand.hbm [shape: f32[1,32], index: 2, kind: input, shape index: {}]   ;;  %s727_s3 = inlined_call_operand.vmem [shape: bf16[32,32], index: 3, kind: input, shape index: {}]   ;;  %s728_s4 = inlined_call_operand.hbm [shape: f32[1,32], index: 4, kind: input, shape index: {}]   ;;  %s729_s5 = inlined_call_operand.hbm [shape: bf16[32,32], index: 5, kind: input, shape index: {}]   ;;  %s730_s6 = inlined_call_operand.vmem [shape: f32[1,32], index: 6, kind: input, shape index: {}]   ;;  %s731_s7 = inlined_call_operand.hbm [shape: bf16[32,32], index: 7, kind: input, shape index: {}]   ;;  %s732_s8 = inlined_call_operand.vmem [shape: f32[1,32], index: 8, kind: input, shape index: {}]   ;;  %s733_s9 = inlined_call_operand.hbm [shape: bf16[32,32], index: 9, kind: input, shape index: {}]   ;;  %s734_s10 = inlined_call_operand.vmem [shape: f32[1,32], index: 10, kind: input, shape index: {}]   ;;  %s735_s11 = inlined_call_operand.vmem [shape: bf16[32,4], index: 11, kind: input, shape index: {}]   ;;  %s736_s12 = inlined_call_operand.vmem [shape: f32[1,4], index: 12, kind: input, shape index: {}]   ;;  %s737_s13 = inlined_call_operand.vmem [shape: f32[8,4], index: 13, kind: output, shape index: {}]  }
   0x1   :  { %19 = vsyncpa [#allocation5], 0 }
   0x2   :  { %20 = vsyncpa [#allocation8], 0  ;;  %s42_s27 = sshll.u32 %s726_s2, 4  ;;  %s43_s27 = int_to_ptr.hbm [resolvable:$true] %s42_s27 }
   0x3   :  { %21 = vsyncpa [#allocation11], 0  ;;  %s593_s28 = smov [#allocation4]   ;;  %s65_s15 = sshll.u32 %s729_s5, 4  ;;  %s66_s15 = int_to_ptr.hbm [resolvable:$true] %s65_s15 }
   0x4   :  { %s44_s29 = sshll.u32 %s593_s28, 4  ;;  %s594_s16 = smov [#allocation7]   ;;  %s45_s29 = int_to_ptr.vmem [resolvable:$true] %s44_s29 }
   0x5   :  { %47 = dma.hbm_to_vmem [thread:$0]  %s43_s27, 16, %s45_s29, [#allocation5]  }
   0x6   :  { %s67_s17 = sshll.u32 %s594_s16, 4  ;;  %s28_s20 = sshll.u32 %s725_s1, 4  ;;  %s68_s17 = int_to_ptr.vmem [resolvable:$true] %s67_s17  ;;  %s29_s20 = int_to_ptr.hbm [resolvable:$true] %s28_s20 }
   0x7   :  { %s595_s2 = smov 64   ;;  %s596_s21 = smov 4  }
   0x8   :  { %73 = dma.hbm_to_vmem [thread:$0]  %s66_s15, 256, %s68_s17, [#allocation8], %s595_s2, %s595_s2, %s596_s21  }
   0x9   :  { %s55_s24 = sshll.u32 %s728_s4, 4  ;;  %s597_s25 = smov [#allocation2]   ;;  %s56_s24 = int_to_ptr.hbm [resolvable:$true] %s55_s24 }
   0xa   :  { %s30_s26 = sshll.u32 %s597_s25, 4  ;;  %s598_s5 = smov [#allocation6]   ;;  %s31_s26 = int_to_ptr.vmem [resolvable:$true] %s30_s26 }
   0xb   :  { %36 = dma.hbm_to_vmem [thread:$0]  %s29_s20, 128, %s31_s26, [#allocation3], %s595_s2, %s595_s2, %s596_s21  }
   0xc   :  { %s57_s27 = sshll.u32 %s598_s5, 4  ;;  %s80_s1 = sshll.u32 %s731_s7, 4  ;;  %s58_s27 = int_to_ptr.vmem [resolvable:$true] %s57_s27  ;;  %s81_s1 = int_to_ptr.hbm [resolvable:$true] %s80_s1 }
   0xd   :  { %60 = dma.hbm_to_vmem [thread:$0]  %s56_s24, 16, %s58_s27, [#allocation5]  }
   0xe   :  { %s95_s15 = sshll.u32 %s733_s9, 4  ;;  %s599_s16 = smov [#allocation9]   ;;  %s96_s15 = int_to_ptr.hbm [resolvable:$true] %s95_s15 }
   0xf   :  { %s82_s4 = sshll.u32 %s599_s16, 4  ;;  %s600_s17 = smov [#allocation10]   ;;  %s83_s4 = int_to_ptr.vmem [resolvable:$true] %s82_s4 }
  0x10   :  { %88 = dma.hbm_to_vmem [thread:$0]  %s81_s1, 256, %s83_s4, [#allocation8], %s595_s2, %s595_s2, %s596_s21  }
  0x11   :  { %s97_s18 = sshll.u32 %s600_s17, 4  ;;  %s98_s18 = int_to_ptr.vmem [resolvable:$true] %s97_s18 }
  0x12   :  { %103 = dma.hbm_to_vmem [thread:$0]  %s96_s15, 256, %s98_s18, [#allocation11], %s595_s2, %s595_s2, %s596_s21  }
  0x13   :  { %585 = dma.done.wait [#allocation3], 128  }
  0x14   :  { %586 = vsyncadd [#allocation3], 4294967168 }
  0x15   :  { %587 = dma.done.wait [#allocation5], 32  }
  0x16   :  { %588 = vsyncadd [#allocation5], 4294967264 }
  0x17   :  { %589 = dma.done.wait [#allocation8], 512  }
  0x18   :  { %590 = vsyncadd [#allocation8], 4294966784 }
  0x19   :  { %591 = dma.done.wait [#allocation11], 256  }
  0x1a   :  { %592 = vsyncadd [#allocation11], 4294967040  ;;  %v416_v0 = vld [vmem:[#allocation2] sm:$0xff]  ;;  %vm148_vm0 = vcmask 130048   ;;  %v418_v2 = vld [vmem:[%s727_s3 + $0x8] sm:$0xff]  ;;  %vm187_vm1 = vcmask 261120  }
  0x1b   :  { %v135_v1 = vld [vmem:[%s724_s0] sm:$0xf]  ;;  %159 = vmatpush.bf16.msra.mxu0 %v416_v0  ;;  %197 = vmatpush.bf16.msra.mxu1 %v418_v2  ;;  %v435_v4 = vld [vmem:[#allocation4] ss:$0 sm:$0xff]  ;;  %v420_v10 = vld [vmem:[#allocation7 + $0x8] sm:$0xff]  ;;  %vm356_vm2 = vcmask 31744  }
  0x1c   :  { %v417_v3 = vld [vmem:[%s727_s3] sm:$0xff]  ;;  %235 = vmatpush.bf16.msra.mxu2 %v420_v10  ;;  %v419_v11 = vld [vmem:[#allocation7] sm:$0xff]  ;;  %v436_v12 = vld [vmem:[#allocation6] ss:$0 sm:$0xff] }
  0x1d   :  { %v422_v18 = vld [vmem:[#allocation9 + $0x8] sm:$0xff]  ;;  %v421_v19 = vld [vmem:[#allocation9] sm:$0xff]  ;;  %v424_v20 = vld [vmem:[#allocation10 + $0x8] sm:$0xff] }
  0x1e   :  { %370 = vmatmul.msk.bf16.vlgmr.msra.gmra.mxu0 %vm148_vm0, %v135_v1  ;;  %273 = vmatpush.bf16.msra.mxu3 %v422_v18  ;;  %v423_v21 = vld [vmem:[#allocation10] sm:$0xff]  ;;  %v437_v22 = vld [vmem:[%s730_s6] ss:$0 sm:$0xff] }
  0x1f   :  { %198 = vmatpush.bf16.msra.mxu1 %v417_v3  ;;  %311 = vmatpush.bf16.msrb.mxu0 %v424_v20  ;;  %v426_v28 = vld [vmem:[%s735_s11 + $0x8] sm:$0xff]  ;;  %v425_v29 = vld [vmem:[%s735_s11] sm:$0xff] }
  0x20   :  { %236 = vmatpush.bf16.msra.mxu2 %v419_v11  ;;  %v438_v30 = vld [vmem:[%s732_s8] ss:$0 sm:$0xff] }
  0x21   :  { %v439_v36 = vld [vmem:[%s734_s10] ss:$0 sm:$0xff] }
  0x22   :  { %274 = vmatpush.bf16.msra.mxu3 %v421_v19  ;;  %v440_v42 = vld [vmem:[%s736_s12] ss:$0 sm:$0xff] }
  0x23   :  { %312 = vmatpush.bf16.msrb.mxu0 %v423_v21  ;;  %349 = vmatpush.bf16.msrb.mxu1 %v426_v28 }
  0x27   :  { %350 = vmatpush.bf16.msrb.mxu1 %v425_v29 }
  0x9b   :  { %v161_v5 = vpop.f32.mrf.mxu0 }
  0x9c   :  { %v162_v6 = vadd.f32 %v435_v4, %v161_v5 }
  0x9e   :  { %v165_v7 = vmax.f32 %v162_v6, 0.0 }
  0xa0   :  { %v166_v8 = vpack.c.bf16 %v165_v7, %v165_v7 }
  0xa2   :  { %379 = vmatmul.msk.bf16.vlgmr.msra.gmra.mxu1 %vm187_vm1, %v166_v8 }
  0xa3   :  { %v163_v9 = vpop.f32.mrf.mxu0 }
 0x11f   :  { %v200_v13 = vpop.f32.mrf.mxu1 }
 0x120   :  { %v201_v14 = vadd.f32 %v436_v12, %v200_v13 }
 0x122   :  { %v204_v15 = vmax.f32 %v201_v14, 0.0 }
 0x124   :  { %v205_v16 = vpack.c.bf16 %v204_v15, %v204_v15 }
 0x126   :  { %388 = vmatmul.msk.bf16.vlgmr.msra.gmra.mxu2 %vm187_vm1, %v205_v16 }
 0x127   :  { %v202_v17 = vpop.f32.mrf.mxu1 }
 0x1a9   :  { %v238_v23 = vpop.f32.mrf.mxu2 }
 0x1aa   :  { %v239_v24 = vadd.f32 %v437_v22, %v238_v23 }
 0x1ac   :  { %v242_v25 = vmax.f32 %v239_v24, 0.0 }
 0x1ae   :  { %v243_v26 = vpack.c.bf16 %v242_v25, %v242_v25 }
 0x1b0   :  { %397 = vmatmul.msk.bf16.vlgmr.msra.gmra.mxu3 %vm187_vm1, %v243_v26 }
 0x1b1   :  { %v240_v27 = vpop.f32.mrf.mxu2 }
 0x233   :  { %v276_v31 = vpop.f32.mrf.mxu3 }
 0x234   :  { %v277_v32 = vadd.f32 %v438_v30, %v276_v31 }
 0x236   :  { %v280_v33 = vmax.f32 %v277_v32, 0.0 }
 0x238   :  { %v281_v34 = vpack.c.bf16 %v280_v33, %v280_v33 }
 0x23a   :  { %406 = vmatmul.msk.bf16.vlgmr.msrb.gmra.mxu0 %vm187_vm1, %v281_v34 }
 0x23b   :  { %v278_v35 = vpop.f32.mrf.mxu3 }
 0x2b7   :  { %v314_v37 = vpop.f32.mrf.mxu0 }
 0x2b8   :  { %v315_v38 = vadd.f32 %v439_v36, %v314_v37 }
 0x2ba   :  { %v318_v39 = vmax.f32 %v315_v38, 0.0 }
 0x2bc   :  { %v319_v40 = vpack.c.bf16 %v318_v39, %v318_v39 }
 0x2be   :  { %415 = vmatmul.msk.bf16.vlgmr.msrb.gmra.mxu1 %vm187_vm1, %v319_v40 }
 0x2bf   :  { %v316_v41 = vpop.f32.mrf.mxu0 }
 0x33b   :  { %v352_v43 = vpop.f32.mrf.mxu1 }
 0x33c   :  { %v353_v44 = vadd.f32 %v440_v42, %v352_v43 }
 0x33e   :  { %357 = vst.msk [vmem:[%s737_s13] sm:$0xff] %vm356_vm2, %v353_v44 }
 0x343   :  { %v354_v45 = vpop.f32.mrf.mxu1 }
 0x344   :  { %362 = vsyncpa [#allocation3], 1 }
 0x345   :  { %363 = vsyncpa [#allocation5], 1 }
 0x346   :  { %364 = vsyncpa [#allocation8], 1 }
 0x347   :  { %365 = vsyncpa [#allocation11], 1 }

</bundles_post_ra>
